<compile_context>
chip_gen: v5e
topology: v5e:2x2
jax: 0.10.0
libtpu: 0.0.40
codegen_flags: <defaults>
</compile_context>

<pallas_src>
import functools

import jax
import jax.numpy as jnp
from jax.experimental import pallas as pl
from jax.experimental.pallas import tpu as pltpu

_EPS = 1e-3          # nn.InstanceNorm3d(..., eps=0.001)
_LANE = 128
_SUBLANE = 8


def _cdiv(a, b):
    return (a + b - 1) // b


def _round_up(x, m):
    return _cdiv(x, m) * m


@functools.lru_cache(maxsize=None)
def _vmem_capacity_bytes():
    try:
        cap = int(getattr(pltpu.get_tpu_info(), "vmem_capacity_bytes", 0))
        if cap > 0:
            return cap
    except Exception:
        pass
    return 64 * 1024 * 1024     # conservative fallback (v7x per-TC VMEM)


def _compiler_params(dim_sem, vmem_limit):
    return pltpu.CompilerParams(
        dimension_semantics=dim_sem,
        vmem_limit_bytes=int(vmem_limit),
    )


# --------------------------------------------------------------- fused one pass
def _br_fused_kernel(x_ref, o_ref, *, s_valid, ragged, apply_in_dtype):
    x = x_ref[...]
    xf = x.astype(jnp.float32)
    if ragged:
        # Block extends past S (lane padding); zero it so the raw moments are
        # exact.  Only emitted when S % 128 != 0.
        lane = jax.lax.broadcasted_iota(jnp.int32, xf.shape, xf.ndim - 1)
        xf = jnp.where(lane < s_valid, xf, 0.0)
    inv = jnp.float32(1.0 / s_valid)
    mean = jnp.sum(xf, axis=-1, keepdims=True) * inv
    ex2 = jnp.sum(xf * xf, axis=-1, keepdims=True) * inv
    # Raw-moment variance (clamped >= 0 against f32 cancellation).
    var = jnp.maximum(ex2 - mean * mean, 0.0)
    rstd = jax.lax.rsqrt(var + jnp.float32(_EPS))
    if apply_in_dtype:          # bf16 apply stage (reductions stayed f32)
        y = (x - mean.astype(x.dtype)) * rstd.astype(x.dtype)
    else:
        y = (xf - mean) * rstd
    o_ref[...] = jnp.maximum(y, 0.0).astype(o_ref.dtype)


# --------------------------------------------------------------- tiled two pass
def _br_stats_kernel(x_ref, psum_ref, *, s_valid, block_s, s_inner, ragged):
    k = pl.program_id(2)

    @pl.when(k == 0)
    def _():
        psum_ref[...] = jnp.zeros_like(psum_ref)

    x = x_ref[...].astype(jnp.float32)
    if ragged:
        p = pl.program_id(0)
        start = (p * s_inner + k) * block_s
        lane = jax.lax.broadcasted_iota(jnp.int32, x.shape, 1) + start
        x = jnp.where(lane < s_valid, x, 0.0)
    s1 = jnp.sum(x, axis=-1, keepdims=True)
    s2 = jnp.sum(x * x, axis=-1, keepdims=True)
    psum_ref[...] += jnp.concatenate([s1, s2], axis=-1)[None, :, :]


def _br_norm_kernel(x_ref, psum_ref, o_ref, *, s_valid, apply_in_dtype):
    x = x_ref[...]
    sums = jnp.sum(psum_ref[...], axis=0)            # combine parallel S chunks
    inv = jnp.float32(1.0 / s_valid)
    mean = sums[:, 0:1] * inv
    var = jnp.maximum(sums[:, 1:2] * inv - mean * mean, 0.0)
    rstd = jax.lax.rsqrt(var + jnp.float32(_EPS))
    if apply_in_dtype:
        y = (x - mean.astype(x.dtype)) * rstd.astype(x.dtype)
    else:
        y = (x.astype(jnp.float32) - mean) * rstd
    o_ref[...] = jnp.maximum(y, 0.0).astype(o_ref.dtype)


@functools.partial(jax.jit, static_argnames=("fused_budget_bytes",))
def br_forward(x, *, fused_budget_bytes=None):
    """x: (N, C, D, H, W) -> ReLU(InstanceNorm3d(eps=1e-3, affine=False)(x))."""
    N, C, D, H, W = x.shape
    S = D * H * W
    rows = N * C
    itemsize = jnp.dtype(x.dtype).itemsize
    row_unit = max(_SUBLANE, 32 // max(1, itemsize))      # 8 f32 / 16 bf16
    apply_in_dtype = (x.dtype == jnp.bfloat16)

    # Per-chip budgets: 128 MiB VMEM (v5e/v6e) -> ~96 MiB limit / ~57 MiB tiles,
    # 64 MiB (v7x) -> 48 MiB limit / ~28 MiB tiles.
    vmem_cap = _vmem_capacity_bytes()
    vmem_limit = min((vmem_cap * 3) // 4, 100 * 1024 * 1024)
    if fused_budget_bytes is None:
        fused_budget_bytes = (vmem_limit * 3) // 5
    # Per-element cost of one block: double-buffered in + out plus ~2 f32 temps.
    bytes_per_elem = 4 * itemsize + 8
    max_block_elems = max(row_unit * _LANE, fused_budget_bytes // bytes_per_elem)

    x2 = x.reshape(rows, S)                               # free contiguous view
    S_blk = _round_up(S, _LANE)                           # logical block width
    ragged_s = (S_blk != S)
    rows_units = _cdiv(rows, row_unit)

    if row_unit * S_blk <= max_block_elems:
        # ---------------- fused path: whole spatial extent per tile -----------
        cap_units = max(1, max_block_elems // (row_unit * S_blk))
        tgt_units = _cdiv(rows_units, 8)                  # aim for ~8 grid steps
        min_units = max(1, _cdiv(1 << 20, row_unit * S_blk * itemsize))  # >=1MiB
        block_units = max(1, min(cap_units, rows_units, max(tgt_units, min_units)))
        block_rows = block_units * row_unit

        out2 = pl.pallas_call(
            functools.partial(_br_fused_kernel, s_valid=S, ragged=ragged_s,
                              apply_in_dtype=apply_in_dtype),
            out_shape=jax.ShapeDtypeStruct((rows, S), x.dtype),
            grid_spec=pltpu.PrefetchScalarGridSpec(
                num_scalar_prefetch=0,
                grid=(_cdiv(rows, block_rows),),
                in_specs=[pl.BlockSpec((block_rows, S_blk), lambda i: (i, 0))],
                out_specs=pl.BlockSpec((block_rows, S_blk), lambda i: (i, 0)),
            ),
            compiler_params=_compiler_params(("parallel",), vmem_limit),
        )(x2)
    else:
        # ---------------- tiled path: stats sweep + normalize sweep -----------
        block_rows = row_unit
        row_grid = _cdiv(rows, block_rows)
        s_units = _cdiv(S, _LANE)
        su_cap = max(1, max_block_elems // (block_rows * _LANE))
        su_tgt = _cdiv(s_units, 8)                        # ~8 pipeline steps
        su_min = max(1, (1 << 20) // (block_rows * _LANE * itemsize))  # >=1 MiB
        block_su = max(1, min(su_cap, s_units, max(su_tgt, su_min)))
        block_s = block_su * _LANE
        s_grid = _cdiv(S, block_s)
        ragged_tile = (S % block_s != 0)

        # Few-instance inputs: split S into 2 "parallel" chunks of partial sums
        # so both v7x TensorCores have work during the stats sweep.
        n_par = 2 if (row_grid == 1 and s_grid >= 2 and s_grid % 2 == 0) else 1
        s_inner = s_grid // n_par

        psum = pl.pallas_call(
            functools.partial(_br_stats_kernel, s_valid=S, block_s=block_s,
                              s_inner=s_inner, ragged=ragged_tile),
            out_shape=jax.ShapeDtypeStruct((n_par, rows, 2), jnp.float32),
            grid_spec=pltpu.PrefetchScalarGridSpec(
                num_scalar_prefetch=0,
                grid=(n_par, row_grid, s_inner),
                in_specs=[pl.BlockSpec(
                    (block_rows, block_s),
                    lambda p, i, k: (i, p * s_inner + k))],
                out_specs=pl.BlockSpec((1, block_rows, 2),
                                       lambda p, i, k: (p, i, 0)),
            ),
            compiler_params=_compiler_params(
                ("parallel", "parallel", "arbitrary"), vmem_limit),
        )(x2)

        out2 = pl.pallas_call(
            functools.partial(_br_norm_kernel, s_valid=S,
                              apply_in_dtype=apply_in_dtype),
            out_shape=jax.ShapeDtypeStruct((rows, S), x.dtype),
            grid_spec=pltpu.PrefetchScalarGridSpec(
                num_scalar_prefetch=0,
                grid=(row_grid, s_grid),
                in_specs=[pl.BlockSpec((block_rows, block_s),
                                       lambda i, k: (i, k)),
                          pl.BlockSpec((n_par, block_rows, 2),
                                       lambda i, k: (0, i, 0))],
                out_specs=pl.BlockSpec((block_rows, block_s),
                                       lambda i, k: (i, k)),
            ),
            compiler_params=_compiler_params(("parallel", "parallel"),
                                             vmem_limit),
        )(x2, psum)

    return out2.reshape(N, C, D, H, W)


def _reference(x):
    xf = x.astype(jnp.float32)
    mean = jnp.mean(xf, axis=(2, 3, 4), keepdims=True)
    var = jnp.mean((xf - mean) ** 2, axis=(2, 3, 4), keepdims=True)
    y = (xf - mean) * jax.lax.rsqrt(var + _EPS)
    return jnp.maximum(y, 0.0).astype(x.dtype)


if __name__ == "__main__":
    # TODO(synk): momentum / running-stats bookkeeping is a no-op because
    # nn.InstanceNorm3d defaults to track_running_stats=False.
    root = jax.random.PRNGKey(0)
    ka, kb, kc, kd, ke = jax.random.split(root, 5)

    # A: fused path, lane/sublane aligned f32.
    xa = jax.random.normal(ka, (2, 4, 4, 8, 8), dtype=jnp.float32)
    outa = jax.block_until_ready(br_forward(xa))
    assert outa.shape == xa.shape
    assert jnp.allclose(outa, _reference(xa), atol=1e-4, rtol=1e-4)

    # B: tiled two-pass path forced via a tiny budget; ragged rows + lanes,
    # exercises the parallel-S partial-sum combine (n_par=2).
    xb = jax.random.normal(kb, (1, 2, 4, 9, 11), dtype=jnp.float32)
    outb = jax.block_until_ready(br_forward(xb, fused_budget_bytes=64 * 1024))
    assert jnp.allclose(outb, _reference(xb), atol=1e-4, rtol=1e-4)

    # C: fused path with ragged spatial extent (boundary block + in-kernel mask).
    xc = jax.random.normal(kc, (2, 3, 3, 5, 7), dtype=jnp.float32)
    outc = jax.block_until_ready(br_forward(xc))
    assert jnp.allclose(outc, _reference(xc), atol=1e-4, rtol=1e-4)

    # D: tiled path with several row blocks (n_par=1, aligned S tiles).
    xd = jax.random.normal(kd, (2, 8, 4, 8, 8), dtype=jnp.float32)
    outd = jax.block_until_ready(br_forward(xd, fused_budget_bytes=16 * 1024))
    assert jnp.allclose(outd, _reference(xd), atol=1e-4, rtol=1e-4)

    # E: bf16 input -> bf16 apply stage (loose tolerance: bf16 quantization).
    xe = jax.random.normal(ke, (2, 4, 4, 8, 8), dtype=jnp.bfloat16)
    oute = jax.block_until_ready(br_forward(xe))
    assert jnp.allclose(oute.astype(jnp.float32),
                        _reference(xe).astype(jnp.float32),
                        atol=1e-1, rtol=1e-1)

    print("KERNEL_OK")
</pallas_src>

<mosaic_0001>
module attributes {stable_mosaic.version = 11 : i64} {
  func.func @_br_fused_kernel(%arg0: i32, %arg1: memref<8x256xf32, #tpu.memory_space<vmem>>, %arg2: memref<8x256xf32, #tpu.memory_space<vmem>>) attributes {dimension_semantics = [#tpu.dimension_semantics<parallel>], iteration_bounds = array<i64: 1>, scalar_prefetch = 0 : i64, scratch_operands = 0 : i64, tpu.core_type = #tpu.core_type<tc>, window_params = [{transform_indices = @transform_0, window_bounds = array<i64: 8, 256>}, {transform_indices = @transform_1, window_bounds = array<i64: 8, 256>}]} {
    %c0 = arith.constant 0 : index
    %c0_0 = arith.constant 0 : index
    %0 = vector.load %arg1[%c0, %c0_0] : memref<8x256xf32, #tpu.memory_space<vmem>>, vector<8x256xf32>
    %cst = arith.constant dense<0.000000e+00> : vector<8xf32>
    %1 = vector.multi_reduction <add>, %0, %cst [1] : vector<8x256xf32> to vector<8xf32>
    %2 = vector.shape_cast %1 : vector<8xf32> to vector<8x1xf32>
    %cst_1 = arith.constant 3.906250e-03 : f32
    %3 = vector.broadcast %cst_1 : f32 to vector<8x1xf32>
    %4 = arith.mulf %2, %3 : vector<8x1xf32>
    %5 = arith.mulf %0, %0 : vector<8x256xf32>
    %cst_2 = arith.constant dense<0.000000e+00> : vector<8xf32>
    %6 = vector.multi_reduction <add>, %5, %cst_2 [1] : vector<8x256xf32> to vector<8xf32>
    %7 = vector.shape_cast %6 : vector<8xf32> to vector<8x1xf32>
    %cst_3 = arith.constant 3.906250e-03 : f32
    %8 = vector.broadcast %cst_3 : f32 to vector<8x1xf32>
    %9 = arith.mulf %7, %8 : vector<8x1xf32>
    %10 = arith.mulf %4, %4 : vector<8x1xf32>
    %11 = arith.subf %9, %10 : vector<8x1xf32>
    %cst_4 = arith.constant 0.000000e+00 : f32
    %12 = vector.broadcast %cst_4 : f32 to vector<8x1xf32>
    %13 = arith.maximumf %11, %12 : vector<8x1xf32>
    %cst_5 = arith.constant 1.000000e-03 : f32
    %14 = vector.broadcast %cst_5 : f32 to vector<8x1xf32>
    %15 = arith.addf %13, %14 : vector<8x1xf32>
    %16 = math.rsqrt %15 : vector<8x1xf32>
    %17 = vector.broadcast %4 : vector<8x1xf32> to vector<8x256xf32>
    %18 = arith.subf %0, %17 : vector<8x256xf32>
    %19 = vector.broadcast %16 : vector<8x1xf32> to vector<8x256xf32>
    %20 = arith.mulf %18, %19 : vector<8x256xf32>
    %cst_6 = arith.constant 0.000000e+00 : f32
    %21 = vector.broadcast %cst_6 : f32 to vector<8x256xf32>
    %22 = arith.maximumf %20, %21 : vector<8x256xf32>
    %c0_7 = arith.constant 0 : index
    %c0_8 = arith.constant 0 : index
    %23 = vector.load %arg2[%c0_7, %c0_8] : memref<8x256xf32, #tpu.memory_space<vmem>>, vector<8x256xf32>
    tpu.vector_store %arg2[%c0_7, %c0_8], %22 {strides = array<i32>} : memref<8x256xf32, #tpu.memory_space<vmem>>, vector<8x256xf32>,
    return
  }
  func.func @transform_0(%arg0: i32) -> (i32, i32) {
    %c0_i32 = arith.constant 0 : i32
    %c0_i32_0 = arith.constant 0 : i32
    return %arg0, %c0_i32 : i32, i32
  }
  func.func @transform_1(%arg0: i32) -> (i32, i32) {
    %c0_i32 = arith.constant 0 : i32
    %c0_i32_0 = arith.constant 0 : i32
    return %arg0, %c0_i32 : i32, i32
  }
}

</mosaic_0001>

<bundles_post_ra>
// kernel: br_forward.1
= control target key start
LH: loop header
LB: loop body
LE: loop exit
PB: predicated region body
PF: predicated region fallthrough
CT: control target
= control target key end

     0   :  { %s70_s0 = inlined_call_operand.vmem [shape: f32[8,256], index: 0, kind: input, shape index: {}]   ;;  %s71_s1 = inlined_call_operand.vmem [shape: f32[8,256], index: 1, kind: output, shape index: {}]  }
   0x1   :  { %v8_v0 = vld [vmem:[%s70_s0] sm:$0xff]  ;;  %v9_v1 = vld [vmem:[%s70_s0 + $0x8] sm:$0xff] }
   0x2   :  { %v10_v2 = vadd.f32 %v9_v1, %v8_v0  ;;  %v14_v3 = vmul.f32 %v8_v0, %v8_v0  ;;  %v15_v4 = vmul.f32 %v9_v1, %v9_v1 }
   0x4   :  { %11 = vadd.xlane.f32.xlu0 %v10_v2  ;;  %v16_v5 = vadd.f32 %v15_v4, %v14_v3 }
   0xc   :  { %17 = vadd.xlane.f32.xlu0 %v16_v5 }
  0x77   :  { %v12_v6 = vpop.xlane.xlu0 %11 }
  0x78   :  { %v13_v7 = vmul.f32 0.00390625, %v12_v6 }
  0x7a   :  { %v20_v9 = vmul.f32 %v13_v7, %v13_v7  ;;  %v34_v20 = vsub.f32 %v8_v0, %v13_v7  ;;  %v35_v21 = vsub.f32 %v9_v1, %v13_v7 }
  0x7f   :  { %v18_v8 = vpop.xlane.xlu0 %17 }
  0x80   :  { %v19_v10 = vmul.f32 0.00390625, %v18_v8 }
  0x82   :  { %v21_v11 = vsub.f32 %v19_v10, %v20_v9 }
  0x84   :  { %v22_v12 = vmax.f32 %v21_v11, 0.0 }
  0x86   :  { %v23_v13 = vadd.f32 0.001, %v22_v12 }
  0x88   :  { %46 = vrsqrt.f32 %v23_v13  ;;  %vm30_vm1 = vweird.f32 %v23_v13 }
  0x8e   :  { %v47_v14 = vpop.eup %46 }
  0x8f   :  { %v25_v15 = vmul.f32 %v47_v14, %v23_v13  ;;  %vm31_vm0 = vweird.f32 %v47_v14 }
  0x90   :  { %vm32_vm2 = vmor %vm30_vm1, %vm31_vm0 }
  0x91   :  { %v26_v16 = vmul.f32 %v47_v14, %v25_v15 }
  0x93   :  { %v27_v17 = vmul.f32 0.5, %v26_v16 }
  0x95   :  { %v28_v18 = vsub.f32 1.5, %v27_v17 }
  0x97   :  { %v29_v19 = vmul.f32 %v47_v14, %v28_v18 }
  0x99   :  { %v33_v22 = vsel %vm32_vm2, %v47_v14, %v29_v19 }
  0x9a   :  { %v36_v23 = vmul.f32 %v34_v20, %v33_v22  ;;  %v37_v24 = vmul.f32 %v35_v21, %v33_v22 }
  0x9c   :  { %v38_v25 = vmax.f32 %v36_v23, 0.0  ;;  %v39_v26 = vmax.f32 %v37_v24, 0.0 }
  0x9e   :  { %40 = vst [vmem:[%s71_s1] sm:$0xff] %v38_v25 }
  0x9f   :  { %41 = vst [vmem:[%s71_s1 + $0x8] sm:$0xff] %v39_v26 }

</bundles_post_ra>
